<compile_context>
chip_gen: v7x
topology: tpu7x:2x2x1
jax: 0.10.0
libtpu: 0.0.40
codegen_flags: <defaults>
</compile_context>

<pallas_src>
import jax
import jax.numpy as jnp
from jax import lax
from jax.experimental import pallas as pl
from jax.experimental.pallas import tpu as pltpu


def _round_up(x, m):
    return (x + m - 1) // m * m


def _make_kernel(tile_n, n_tiles, n_valid, needs_mask):
    """Fused logits + online-softmax + normalized-pred kernel.

    Grid: (batch_tiles, entity_tiles).  The entity axis is a reduction-style
    axis: per-batch-tile logits live in `acc_ref` (VMEM scratch, leading dim
    indexed by the entity-tile id) and the normalized prediction is written to
    `pred_ref` (output block resident across the entity axis) on the last
    entity step only.
    """

    def kernel(x_ref, et_ref, pred_ref, acc_ref, m_sc, l_sc):
        n = pl.program_id(1)
        n_last = pl.num_programs(1) - 1

        @pl.when(n == 0)
        def _():
            m_sc[...] = jnp.full_like(m_sc, -jnp.inf)
            l_sc[...] = jnp.zeros_like(l_sc)

        # (tile_b, d_e) x (d_e, tile_n): canonical MXU feed, bf16 in, f32 acc.
        logits = jnp.dot(x_ref[...], et_ref[...],
                         preferred_element_type=jnp.float32)

        def store_and_update(lg):
            acc_ref[n] = lg                       # dynamic index on leading dim
            m_prev = m_sc[...]
            m_new = jnp.maximum(m_prev, jnp.max(lg, axis=-1, keepdims=True))
            l_sc[...] = jnp.exp(m_prev - m_new) * l_sc[...] + jnp.sum(
                jnp.exp(lg - m_new), axis=-1, keepdims=True)
            m_sc[...] = m_new

        if needs_mask:
            # Padding columns only exist in the last entity tile; the column
            # offset of that tile is a Python constant, so the iota/compare is
            # fully static and only traced under the last-tile branch.
            col = (n_tiles - 1) * tile_n + lax.broadcasted_iota(
                jnp.int32, (1, tile_n), 1)

            @pl.when(n == n_last)
            def _():
                store_and_update(
                    jnp.where(col < n_valid, logits, jnp.float32(-1e30)))

            @pl.when(n != n_last)
            def _():
                store_and_update(logits)
        else:
            store_and_update(logits)

        @pl.when(n == n_last)
        def _():
            lse = m_sc[...] + jnp.log(l_sc[...])
            for i in range(n_tiles):              # static unroll, static slices
                pred_ref[:, i * tile_n:(i + 1) * tile_n] = jnp.exp(
                    acc_ref[i] - lse)

    return kernel


def mdistmult_forward(r_idx, e_idx, E_weight, R_weight, bn_params,
                      *, tile_n=1024, tile_b=128):
    """Gather + folded-BN prologue in XLA, one fused Pallas kernel for the rest."""
    B = r_idx.shape[0]
    N_ent, d_e = E_weight.shape

    # --- Folded BatchNorm (eval mode) + elementwise prologue, hoisted to XLA. ---
    def fold(bn):
        gamma, beta, mean, var, eps = bn
        scale = gamma / jnp.sqrt(var + eps)
        shift = beta - mean * scale
        return scale, shift

    bnr_s, bnr_b = fold(bn_params["bnr"])
    bne_s, bne_b = fold(bn_params["bne"])
    bnw_s, bnw_b = fold(bn_params["bnw"])

    r = R_weight[r_idx].astype(jnp.float32) * bnr_s + bnr_b
    e2 = E_weight[e_idx[0]].astype(jnp.float32) * bne_s + bne_b
    e3 = E_weight[e_idx[1]].astype(jnp.float32) * bne_s + bne_b
    # TODO(synk): input_dropout / hidden_dropout are identity in eval mode;
    # training-mode stochastic dropout is not implemented here.
    x = (r * e2 * e3) * bnw_s + bnw_b            # (B, d_e), f32
    x = x.astype(jnp.bfloat16)                   # single bf16 MXU activation

    # --- Tiling ((8, 128) alignment). ---
    tile_n = min(tile_n, _round_up(N_ent, 128))
    N_pad = _round_up(N_ent, tile_n)
    n_tiles = N_pad // tile_n
    needs_mask = (N_pad != N_ent)

    tile_b = max(8, min(tile_b, _round_up(B, 8)))
    if B >= 16:
        # Keep >= 2 batch blocks so the "parallel" axis can feed both v7x TCs.
        tile_b = min(tile_b, _round_up((B + 1) // 2, 8))

    # Resident working set per batch tile: logits scratch + (assumed
    # double-buffered) resident pred output stripe + double-buffered inputs.
    def working_set(tb):
        stripe = tb * N_pad * 4
        return (3 * stripe
                + 2 * tb * d_e * 2
                + 2 * d_e * tile_n * 2
                + 4 * tb * 4)

    try:
        vmem_cap = getattr(pltpu.get_tpu_info(), "vmem_capacity_bytes",
                           64 << 20)
    except Exception:
        vmem_cap = 64 << 20    # conservative: v7x per-TC VMEM
    budget = vmem_cap * 3 // 4
    while tile_b > 8 and working_set(tile_b) > budget:
        tile_b = max(8, _round_up(tile_b // 2, 8))
    # TODO(synk): for vocabularies so large that even tile_b=8 overflows VMEM,
    # a two-pass scheme (stats-only pass, then recompute + normalize) is needed.
    B_pad = _round_up(B, tile_b)
    vmem_limit = int(min(budget, max(32 << 20, 2 * working_set(tile_b))))

    # --- Pad & lay out kernel operands. ---
    if B_pad != B:
        x = jnp.pad(x, ((0, B_pad - B), (0, 0)))
    Et = E_weight.T.astype(jnp.bfloat16)         # (d_e, N_ent): K-major RHS
    if N_pad != N_ent:
        Et = jnp.pad(Et, ((0, 0), (0, N_pad - N_ent)))

    grid = (B_pad // tile_b, n_tiles)

    pred = pl.pallas_call(
        _make_kernel(tile_n, n_tiles, N_ent, needs_mask),
        out_shape=jax.ShapeDtypeStruct((B_pad, N_pad), jnp.float32),
        grid_spec=pltpu.PrefetchScalarGridSpec(
            num_scalar_prefetch=0,
            grid=grid,
            in_specs=[
                pl.BlockSpec((tile_b, d_e), lambda b, n: (b, 0)),
                pl.BlockSpec((d_e, tile_n), lambda b, n: (0, n)),
            ],
            out_specs=pl.BlockSpec((tile_b, N_pad), lambda b, n: (b, 0)),
            scratch_shapes=[
                pltpu.VMEM((n_tiles, tile_b, tile_n), jnp.float32),  # logits
                pltpu.VMEM((tile_b, 1), jnp.float32),                # running max
                pltpu.VMEM((tile_b, 1), jnp.float32),                # running sum
            ]),
        compiler_params=pltpu.CompilerParams(
            dimension_semantics=("parallel", "arbitrary"),
            vmem_limit_bytes=vmem_limit),
    )(x, Et)

    return pred[:B, :N_ent]


if __name__ == "__main__":
    # Small deterministic problem: ary = 3 (one relation + two known entities).
    key = jax.random.PRNGKey(0)
    k_e, k_r, k_ri, k_e2, k_e3 = jax.random.split(key, 5)

    num_entities = 256
    num_relations = 64
    d_e = 128           # d_e == d_r (required by x = r * e2 * e3)
    d_r = 128
    batch = 8

    # Parameters, matching the PyTorch init: 0.001 * randn
    E_weight = 0.001 * jax.random.normal(k_e, (num_entities, d_e), jnp.float32)
    R_weight = 0.001 * jax.random.normal(k_r, (num_relations, d_r), jnp.float32)

    # Fresh BatchNorm1d parameters (gamma=1, beta=0, mean=0, var=1, eps=1e-5).
    def fresh_bn(dim):
        return (jnp.ones((dim,), jnp.float32),   # gamma
                jnp.zeros((dim,), jnp.float32),  # beta
                jnp.zeros((dim,), jnp.float32),  # running_mean
                jnp.ones((dim,), jnp.float32),   # running_var
                jnp.float32(1e-5))               # eps
    bn_params = {"bnr": fresh_bn(d_r), "bne": fresh_bn(d_e), "bnw": fresh_bn(d_e)}

    r_idx = jax.random.randint(k_ri, (batch,), 0, num_relations, jnp.int32)
    e_idx = (jax.random.randint(k_e2, (batch,), 0, num_entities, jnp.int32),
             jax.random.randint(k_e3, (batch,), 0, num_entities, jnp.int32))
    miss_ent_domain = 1  # unused in compute, kept for signature parity
    # TODO(synk): ary == 4 branch (third known entity) not exercised here.

    pred = mdistmult_forward(r_idx, e_idx, E_weight, R_weight, bn_params)
    pred = jax.block_until_ready(pred)

    # Pure-JAX f32 reference.
    def bn_apply(xv, bn):
        g, b, m, v, eps = bn
        return (xv - m) / jnp.sqrt(v + eps) * g + b
    r_ref = bn_apply(R_weight[r_idx], bn_params["bnr"])
    e2_ref = bn_apply(E_weight[e_idx[0]], bn_params["bne"])
    e3_ref = bn_apply(E_weight[e_idx[1]], bn_params["bne"])
    x_ref = bn_apply(r_ref * e2_ref * e3_ref, bn_params["bnw"])
    ref = jax.nn.softmax(x_ref @ E_weight.T, axis=1)

    assert pred.shape == (batch, num_entities)
    assert jnp.allclose(jnp.sum(pred, axis=1), 1.0, atol=1e-4)
    # Tolerance loosened vs the f32 reference because E / x stream in bf16.
    assert jnp.allclose(pred, ref, atol=5e-4, rtol=5e-3), "mismatch vs reference"
    print("KERNEL_OK")
</pallas_src>

<mosaic_0001>
module attributes {stable_mosaic.version = 11 : i64} {
  func.func @kernel(%arg0: i32, %arg1: i32, %arg2: memref<8x128xbf16, #tpu.memory_space<vmem>>, %arg3: memref<128x256xbf16, #tpu.memory_space<vmem>>, %arg4: memref<8x256xf32, #tpu.memory_space<vmem>>, %arg5: memref<1x8x256xf32, #tpu.memory_space<vmem>>, %arg6: memref<8x1xf32, #tpu.memory_space<vmem>>, %arg7: memref<8x1xf32, #tpu.memory_space<vmem>>) attributes {dimension_semantics = [#tpu.dimension_semantics<parallel>, #tpu.dimension_semantics<arbitrary>], iteration_bounds = array<i64: 1, 1>, scalar_prefetch = 0 : i64, scratch_operands = 3 : i64, tpu.core_type = #tpu.core_type<tc>, window_params = [{transform_indices = @transform_0, window_bounds = array<i64: 8, 128>}, {transform_indices = @transform_1, window_bounds = array<i64: 128, 256>}, {transform_indices = @transform_2, window_bounds = array<i64: 8, 256>}]} {
    %c0_i32 = arith.constant 0 : i32
    %0 = arith.cmpi eq, %arg1, %c0_i32 : i32
    %1 = arith.extui %0 : i1 to i32
    %c0_i32_0 = arith.constant 0 : i32
    %2 = arith.cmpi ne, %1, %c0_i32_0 : i32
    scf.if %2 {
      %cst_18 = arith.constant 0xFF800000 : f32
      %29 = vector.broadcast %cst_18 : f32 to vector<8x1xf32>
      %c0_19 = arith.constant 0 : index
      %c0_20 = arith.constant 0 : index
      %30 = vector.load %arg6[%c0_19, %c0_20] : memref<8x1xf32, #tpu.memory_space<vmem>>, vector<8x1xf32>
      tpu.vector_store %arg6[%c0_19, %c0_20], %29 {strides = array<i32>} : memref<8x1xf32, #tpu.memory_space<vmem>>, vector<8x1xf32>,
      %cst_21 = arith.constant 0.000000e+00 : f32
      %31 = vector.broadcast %cst_21 : f32 to vector<8x1xf32>
      %c0_22 = arith.constant 0 : index
      %c0_23 = arith.constant 0 : index
      %32 = vector.load %arg7[%c0_22, %c0_23] : memref<8x1xf32, #tpu.memory_space<vmem>>, vector<8x1xf32>
      tpu.vector_store %arg7[%c0_22, %c0_23], %31 {strides = array<i32>} : memref<8x1xf32, #tpu.memory_space<vmem>>, vector<8x1xf32>,
    } else {
    }
    %c0 = arith.constant 0 : index
    %c0_1 = arith.constant 0 : index
    %3 = vector.load %arg2[%c0, %c0_1] : memref<8x128xbf16, #tpu.memory_space<vmem>>, vector<8x128xbf16>
    %c0_2 = arith.constant 0 : index
    %c0_3 = arith.constant 0 : index
    %4 = vector.load %arg3[%c0_2, %c0_3] : memref<128x256xbf16, #tpu.memory_space<vmem>>, vector<128x256xbf16>
    %cst = arith.constant dense<0.000000e+00> : vector<8x256xf32>
    %5 = tpu.matmul %3, %4, %cst {dimension_numbers = #tpu.dot_dimension_numbers<[1], [0], [0], [1], [0, 0, 1, 1], [], []>} : vector<8x128xbf16>, vector<128x256xbf16>, vector<8x256xf32> -> vector<8x256xf32>
    %6 = arith.index_cast %arg1 : i32 to index
    %c0_4 = arith.constant 0 : index
    %c0_5 = arith.constant 0 : index
    %7 = vector.load %arg5[%6, %c0_4, %c0_5] : memref<1x8x256xf32, #tpu.memory_space<vmem>>, vector<1x8x256xf32>
    %8 = vector.shape_cast %7 : vector<1x8x256xf32> to vector<8x256xf32>
    %9 = vector.shape_cast %5 : vector<8x256xf32> to vector<1x8x256xf32>
    tpu.vector_store %arg5[%6, %c0_4, %c0_5], %9 {strides = array<i32>} : memref<1x8x256xf32, #tpu.memory_space<vmem>>, vector<1x8x256xf32>,
    %c0_6 = arith.constant 0 : index
    %c0_7 = arith.constant 0 : index
    %10 = vector.load %arg6[%c0_6, %c0_7] : memref<8x1xf32, #tpu.memory_space<vmem>>, vector<8x1xf32>
    %cst_8 = arith.constant dense<0xFF800000> : vector<8xf32>
    %11 = vector.multi_reduction <maximumf>, %5, %cst_8 [1] : vector<8x256xf32> to vector<8xf32>
    %12 = vector.shape_cast %11 : vector<8xf32> to vector<8x1xf32>
    %13 = arith.maximumf %10, %12 : vector<8x1xf32>
    %14 = arith.subf %10, %13 : vector<8x1xf32>
    %15 = math.exp %14 : vector<8x1xf32>
    %c0_9 = arith.constant 0 : index
    %c0_10 = arith.constant 0 : index
    %16 = vector.load %arg7[%c0_9, %c0_10] : memref<8x1xf32, #tpu.memory_space<vmem>>, vector<8x1xf32>
    %17 = arith.mulf %15, %16 : vector<8x1xf32>
    %18 = vector.broadcast %13 : vector<8x1xf32> to vector<8x256xf32>
    %19 = arith.subf %5, %18 : vector<8x256xf32>
    %20 = math.exp %19 : vector<8x256xf32>
    %cst_11 = arith.constant dense<0.000000e+00> : vector<8xf32>
    %21 = vector.multi_reduction <add>, %20, %cst_11 [1] : vector<8x256xf32> to vector<8xf32>
    %22 = vector.shape_cast %21 : vector<8xf32> to vector<8x1xf32>
    %23 = arith.addf %17, %22 : vector<8x1xf32>
    %c0_12 = arith.constant 0 : index
    %c0_13 = arith.constant 0 : index
    %24 = vector.load %arg7[%c0_12, %c0_13] : memref<8x1xf32, #tpu.memory_space<vmem>>, vector<8x1xf32>
    tpu.vector_store %arg7[%c0_12, %c0_13], %23 {strides = array<i32>} : memref<8x1xf32, #tpu.memory_space<vmem>>, vector<8x1xf32>,
    %c0_14 = arith.constant 0 : index
    %c0_15 = arith.constant 0 : index
    %25 = vector.load %arg6[%c0_14, %c0_15] : memref<8x1xf32, #tpu.memory_space<vmem>>, vector<8x1xf32>
    tpu.vector_store %arg6[%c0_14, %c0_15], %13 {strides = array<i32>} : memref<8x1xf32, #tpu.memory_space<vmem>>, vector<8x1xf32>,
    %c0_i32_16 = arith.constant 0 : i32
    %26 = arith.cmpi eq, %arg1, %c0_i32_16 : i32
    %27 = arith.extui %26 : i1 to i32
    %c0_i32_17 = arith.constant 0 : i32
    %28 = arith.cmpi ne, %27, %c0_i32_17 : i32
    scf.if %28 {
      %c0_18 = arith.constant 0 : index
      %c0_19 = arith.constant 0 : index
      %29 = vector.load %arg6[%c0_18, %c0_19] : memref<8x1xf32, #tpu.memory_space<vmem>>, vector<8x1xf32>
      %c0_20 = arith.constant 0 : index
      %c0_21 = arith.constant 0 : index
      %30 = vector.load %arg7[%c0_20, %c0_21] : memref<8x1xf32, #tpu.memory_space<vmem>>, vector<8x1xf32>
      %31 = math.log %30 : vector<8x1xf32>
      %32 = arith.addf %29, %31 : vector<8x1xf32>
      %c0_22 = arith.constant 0 : index
      %c0_23 = arith.constant 0 : index
      %c0_24 = arith.constant 0 : index
      %33 = vector.load %arg5[%c0_22, %c0_23, %c0_24] : memref<1x8x256xf32, #tpu.memory_space<vmem>>, vector<1x8x256xf32>
      %34 = vector.shape_cast %33 : vector<1x8x256xf32> to vector<8x256xf32>
      %35 = vector.broadcast %32 : vector<8x1xf32> to vector<8x256xf32>
      %36 = arith.subf %34, %35 : vector<8x256xf32>
      %37 = math.exp %36 : vector<8x256xf32>
      %c0_25 = arith.constant 0 : index
      %c0_26 = arith.constant 0 : index
      %38 = vector.load %arg4[%c0_25, %c0_26] : memref<8x256xf32, #tpu.memory_space<vmem>>, vector<8x256xf32>
      tpu.vector_store %arg4[%c0_25, %c0_26], %37 {strides = array<i32>} : memref<8x256xf32, #tpu.memory_space<vmem>>, vector<8x256xf32>,
    } else {
    }
    return
  }
  func.func @transform_0(%arg0: i32, %arg1: i32) -> (i32, i32) {
    %c0_i32 = arith.constant 0 : i32
    %c0_i32_0 = arith.constant 0 : i32
    return %arg0, %c0_i32 : i32, i32
  }
  func.func @transform_1(%arg0: i32, %arg1: i32) -> (i32, i32) {
    %c0_i32 = arith.constant 0 : i32
    %c0_i32_0 = arith.constant 0 : i32
    return %c0_i32, %arg1 : i32, i32
  }
  func.func @transform_2(%arg0: i32, %arg1: i32) -> (i32, i32) {
    %c0_i32 = arith.constant 0 : i32
    %c0_i32_0 = arith.constant 0 : i32
    return %arg0, %c0_i32 : i32, i32
  }
}

</mosaic_0001>

<bundles_post_ra>
// kernel: tpu_custom_call.1
= control target key start
LH: loop header
LB: loop body
LE: loop exit
PB: predicated region body
PF: predicated region fallthrough
CT: control target
= control target key end

     0   :  { %7 = vsyncpa [#allocation6], 0  ;;  %s460_s0 = inlined_call_operand.hbm [shape: bf16[8,128], index: 0, kind: input, shape index: {}]   ;;  %s461_s1 = inlined_call_operand.hbm [shape: bf16[128,256], index: 1, kind: input, shape index: {}]   ;;  %s462_s2 = inlined_call_operand.hbm [shape: f32[8,256], index: 2, kind: output, shape index: {}]  }
   0x1   :  { %8 = vsyncpa [#allocation9], 0 }
   0x2   :  { %9 = vsyncpa [#allocation7], 0  ;;  %s390_s9 = smov [#allocation5]   ;;  %s391_s11 = smov [#allocation8]  }
   0x3   :  { %s16_s10 = sshll.u32 %s390_s9, 4  ;;  %s25_s12 = sshll.u32 %s391_s11, 4  ;;  %s17_s10 = int_to_ptr.vmem [resolvable:$true] %s16_s10  ;;  %s413_s12 = int_to_ptr.vmem [resolvable:$true] %s25_s12 }
   0x4   :  { %s318_s15 = scalar_lea.hbm %s460_s0, 64 }
   0x5   :  { %p319_p0 = scmp.ne.s32.totalorder %s460_s0, %s318_s15  ;;  %p322_p1 = scmp.lt.u32.totalorder %s318_s15, %s460_s0 }
   0x7   :  { %p324_p2 = pnand %p322_p1, %p319_p0 }
   0x9   :  { %327 = shalt.err (!%p324_p2)
}
   0xa   :  { %s328_s20 = scalar_lea.vmem %s17_s10, 64  ;;  %p333_p4 = scmp.lt.s32.totalorder %s17_s10, %s17_s10 }
   0xb   :  { %p329_p3 = scmp.ne.s32.totalorder %s17_s10, %s328_s20  ;;  %p334_p5 = scmp.lt.s32.totalorder %s328_s20, %s328_s20 }
   0xd   :  { %p335_p6 = por %p334_p5, %p333_p4 }
   0xf   :  { %p336_p7 = pnand %p335_p6, %p329_p3 }
  0x11   :  { %339 = shalt.err (!%p336_p7)
}
  0x12   :  { %19 = dma.hbm_to_vmem [thread:$0]  %s460_s0, 64, %s17_s10, [#allocation6]  }
  0x13   :  { %s340_s25 = scalar_lea.hbm %s461_s1, 2048 }
  0x14   :  { %p341_p8 = scmp.ne.s32.totalorder %s461_s1, %s340_s25  ;;  %p344_p9 = scmp.lt.u32.totalorder %s340_s25, %s461_s1 }
  0x16   :  { %p346_p10 = pnand %p344_p9, %p341_p8 }
  0x18   :  { %349 = shalt.err (!%p346_p10)
}
  0x19   :  { %s350_s30 = scalar_lea.vmem %s413_s12, 2048  ;;  %p355_p12 = scmp.lt.s32.totalorder %s413_s12, %s413_s12 }
  0x1a   :  { %p351_p11 = scmp.ne.s32.totalorder %s413_s12, %s350_s30  ;;  %p356_p13 = scmp.lt.s32.totalorder %s350_s30, %s350_s30 }
  0x1c   :  { %p357_p0 = por %p356_p13, %p355_p12 }
  0x1e   :  { %p358_p1 = pnand %p357_p0, %p351_p11 }
  0x20   :  { %361 = shalt.err (!%p358_p1)
}
  0x21   :  { %s392_s0 = smov 128   ;;  %s393_s3 = smov 8  }
  0x22   :  { %31 = dma.hbm_to_vmem [thread:$0]  %s461_s1, 2048, %s413_s12, [#allocation9], %s392_s0, %s392_s0, %s393_s3  }
  0x23   :  { %384 = dma.done.wait [#allocation6], 64  }
  0x24   :  { %385 = vsyncadd [#allocation6], 4294967232 }
  0x25   :  { %386 = dma.done.wait [#allocation9], 2048  }
  0x26   :  { %387 = vsyncadd [#allocation9], 4294965248  ;;  %v394_v0 = vmov 0   ;;  %v282_v1 = vld [vmem:[#allocation8 + $0x4] ss:$8 sps:$4 sm:$0xff]   ;;  %vm43_vm0 = vcmask 7168  }
  0x27   :  { %175 = vmatprep.mubr.bf16.mxu0 %v394_v0  ;;  %280 = vset.pattern.permute.xlu0 %v394_v0  ;;  %v284_v2 = vld [vmem:[#allocation8] ss:$8 sps:$4 sm:$0xff]   ;;  %v285_v3 = vld [vmem:[#allocation8 + $0x14] ss:$8 sps:$4 sm:$0xff]   ;;  %v287_v4 = vld [vmem:[#allocation8 + $0x10] ss:$8 sps:$4 sm:$0xff]  }
  0x28   :  { %281 = vset.pattern.permute.xlu1 %v394_v0  ;;  %143 = vmatprep.subr.bf16.mxu0 %v282_v1  ;;  %v288_v5 = vld [vmem:[#allocation8 + $0x24] ss:$8 sps:$4 sm:$0xff]   ;;  %v290_v6 = vld [vmem:[#allocation8 + $0x20] ss:$8 sps:$4 sm:$0xff]   ;;  %v291_v7 = vld [vmem:[#allocation8 + $0x34] ss:$8 sps:$4 sm:$0xff]  }
  0x29   :  { %144 = vmatpush1.bf16.msra.mxu0 %v284_v2  ;;  %v293_v8 = vld [vmem:[#allocation8 + $0x30] ss:$8 sps:$4 sm:$0xff]   ;;  %v294_v9 = vld [vmem:[#allocation8 + $0x44] ss:$8 sps:$4 sm:$0xff]   ;;  %v296_v10 = vld [vmem:[#allocation8 + $0x40] ss:$8 sps:$4 sm:$0xff]  }
  0x2a   :  { %145 = vmatprep.subr.bf16.mxu0 %v285_v3  ;;  %v297_v11 = vld [vmem:[#allocation8 + $0x54] ss:$8 sps:$4 sm:$0xff]   ;;  %v299_v12 = vld [vmem:[#allocation8 + $0x50] ss:$8 sps:$4 sm:$0xff]   ;;  %v300_v13 = vld [vmem:[#allocation8 + $0x64] ss:$8 sps:$4 sm:$0xff]  }
  0x2b   :  { %v302_v14 = vld [vmem:[#allocation8 + $0x60] ss:$8 sps:$4 sm:$0xff]   ;;  %v303_v15 = vld [vmem:[#allocation8 + $0x74] ss:$8 sps:$4 sm:$0xff]   ;;  %v305_v16 = vld [vmem:[#allocation8 + $0x70] ss:$8 sps:$4 sm:$0xff]  }
  0x2c   :  { %v46_v17 = vld [vmem:[#allocation5] sm:$0xf]  ;;  %v395_v18 = vmov -inf   ;;  %v396_v24 = vmov 0.0   ;;  %s397_s1 = smov [#allocation10]  }
  0x2d   :  { %146 = vmatpush1.bf16.msra.mxu0 %v287_v4  ;;  %44 = vst.msk [vmem:[#allocation3] sm:$0xff] %vm43_vm0, %v395_v18  ;;  %45 = vst.msk [vmem:[#allocation4] sm:$0xff] %vm43_vm0, %v396_v24  ;;  %s246_s6 = sshll.u32 %s397_s1, 4  ;;  %s247_s6 = int_to_ptr.vmem [resolvable:$true] %s246_s6 }
  0x2e   :  { %147 = vmatprep.subr.bf16.mxu0 %v288_v5  ;;  %s362_s7 = scalar_lea.vmem %s247_s6, 256  ;;  %p367_p3 = scmp.lt.s32.totalorder %s247_s6, %s247_s6 }
  0x2f   :  { %p363_p2 = scmp.ne.s32.totalorder %s247_s6, %s362_s7  ;;  %p368_p4 = scmp.lt.s32.totalorder %s362_s7, %s362_s7 }
  0x31   :  { %148 = vmatpush1.bf16.msra.mxu0 %v290_v6  ;;  %p369_p5 = por %p368_p4, %p367_p3 }
  0x32   :  { %149 = vmatprep.subr.bf16.mxu0 %v291_v7 }
  0x33   :  { %p370_p6 = pnand %p369_p5, %p363_p2 }
  0x34   :  { %v189_v25 = vld [vmem:[#allocation3] sm:$0xff]  ;;  %v197_v39 = vld [vmem:[#allocation4] sm:$0xff] }
  0x35   :  { %150 = vmatpush1.bf16.msra.mxu0 %v293_v8 }
  0x36   :  { %151 = vmatprep.subr.bf16.mxu0 %v294_v9 }
  0x39   :  { %152 = vmatpush1.bf16.msra.mxu0 %v296_v10 }
  0x3a   :  { %153 = vmatprep.subr.bf16.mxu0 %v297_v11 }
  0x3d   :  { %154 = vmatpush1.bf16.msra.mxu0 %v299_v12 }
  0x3e   :  { %155 = vmatprep.subr.bf16.mxu0 %v300_v13 }
  0x41   :  { %156 = vmatpush1.bf16.msra.mxu0 %v302_v14 }
  0x42   :  { %157 = vmatprep.subr.bf16.mxu0 %v303_v15 }
  0x45   :  { %158 = vmatpush1.bf16.msra.mxu0 %v305_v16 }
  0x48   :  { %176 = vmatmul.mubr.bf16.vlgmr.msra.gmra.mrb[0].mxu0 %v46_v17 }
 0x11b   :  { %v177_v19 = vpop.f32.mrb[0].mxu0 }
 0x11c   :  { %v179_v20 = vpop.f32.mrb[1].mxu0 }
 0x11d   :  { %v181_v21 = vpop.f32.mrb[2].mxu0  ;;  %v190_v22 = vmax.f32 %v177_v19, %v179_v20 }
 0x11e   :  { %v182_v23 = vpop.f32.mrb[3].mxu0 }
 0x11f   :  { %191 = vmax.xlane.f32.xlu0 %v190_v22 }
 0x1ac   :  { %v192_v26 = vpop.xlane.xlu0 %191 }
 0x1ad   :  { %v193_v27 = vmax.f32 %v189_v25, %v192_v26 }
 0x1af   :  { %v194_v28 = vsub.f32 %v189_v25, %v193_v27  ;;  %216 = vst.msk [vmem:[#allocation3] sm:$0xff] %vm43_vm0, %v193_v27  ;;  %201 = vperm.xlu0 %280, %v193_v27  }
 0x1b1   :  { %v195_v37 = vmul.f32 1.442695, %v194_v28 }
 0x1b6   :  { %v220_v46 = vld [vmem:[#allocation3] sm:$0xff] }
 0x22e   :  { %v202_v29 = vpop.permute.xlu0 %201 }
 0x22f   :  { %v204_v30 = vsub.f32 %v177_v19, %v202_v29  ;;  %v205_v31 = vsub.f32 %v179_v20, %v202_v29 }
 0x231   :  { %v206_v32 = vmul.f32 1.442695, %v204_v30  ;;  %v208_v33 = vmul.f32 1.442695, %v205_v31 }
 0x233   :  { %306 = vpow2.f32 %v206_v32 }
 0x234   :  { %308 = vpow2.f32 %v208_v33 }
 0x235   :  { %310 = vpow2.f32 %v195_v37 }
 0x23d   :  { %v307_v34 = vpop.eup %306 }
 0x23e   :  { %v309_v35 = vpop.eup %308 }
 0x23f   :  { %v210_v36 = vadd.f32 %v309_v35, %v307_v34  ;;  %v311_v38 = vpop.eup %310 }
 0x240   :  { %v198_v40 = vmul.f32 %v311_v38, %v197_v39 }
 0x241   :  { %211 = vadd.xlane.f32.xlu1 %v210_v36 }
 0x2ce   :  { %v212_v41 = vpop.xlane.xlu1 %211 }
 0x2cf   :  { %v213_v42 = vadd.f32 %v212_v41, %v198_v40 }
 0x2d1   :  { %215 = vst.msk [vmem:[#allocation4] sm:$0xff] %vm43_vm0, %v213_v42 }
 0x2d8   :  { %v221_v43 = vld [vmem:[#allocation4] sm:$0xff] }
 0x2d9   :  { %312 = vlog2.f32 %v221_v43 }
 0x2e3   :  { %v313_v44 = vpop.eup %312 }
 0x2e4   :  { %v223_v45 = vmul.f32 0.6931472, %v313_v44 }
 0x2e6   :  { %v224_v47 = vadd.f32 %v223_v45, %v220_v46 }
 0x2e8   :  { %229 = vperm.xlu1 %281, %v224_v47  }
 0x367   :  { %v230_v48 = vpop.permute.xlu1 %229 }
 0x368   :  { %v232_v49 = vsub.f32 %v177_v19, %v230_v48  ;;  %v233_v50 = vsub.f32 %v179_v20, %v230_v48 }
 0x36a   :  { %v234_v51 = vmul.f32 1.442695, %v232_v49  ;;  %v236_v52 = vmul.f32 1.442695, %v233_v50 }
 0x36c   :  { %314 = vpow2.f32 %v234_v51 }
 0x36d   :  { %316 = vpow2.f32 %v236_v52 }
 0x376   :  { %v315_v53 = vpop.eup %314 }
 0x377   :  { %v317_v54 = vpop.eup %316  ;;  %238 = vst [vmem:[#allocation10] sm:$0xff] %v315_v53 }
 0x378   :  { %239 = vst [vmem:[#allocation10 + $0x8] sm:$0xff] %v317_v54 }
 0x379   :  { %373 = shalt.err (!%p370_p6)
}
 0x37a   :  { %s374_s10 = scalar_lea.hbm %s462_s2, 256 }
 0x37b   :  { %p375_p7 = scmp.ne.s32.totalorder %s462_s2, %s374_s10  ;;  %p378_p8 = scmp.lt.u32.totalorder %s374_s10, %s462_s2 }
 0x37d   :  { %p380_p9 = pnand %p378_p8, %p375_p7 }
 0x37f   :  { %383 = shalt.err (!%p380_p9)
}
 0x380   :  { %249 = dma.vmem_to_hbm [thread:$0]  %s247_s6, 256, %s462_s2, [#allocation7]  }
 0x381   :  { %388 = dma.done.wait [#allocation7], 256  }
 0x382   :  { %389 = vsyncadd [#allocation7], 4294967040 }
 0x383   :  { %253 = vsyncpa [#allocation6], 1 }
 0x384   :  { %254 = vsyncpa [#allocation9], 1 }
 0x385   :  { %255 = vsyncpa [#allocation7], 1 }

</bundles_post_ra>
